<compile_context>
chip_gen: v5e
topology: v5e:2x2
jax: 0.10.0
libtpu: 0.0.40
codegen_flags: <defaults>
</compile_context>

<pallas_src>
import math
import numpy as np
import jax
import jax.numpy as jnp
from jax.experimental import pallas as pl
from jax.experimental.pallas import tpu as pltpu

LANE = 128     # channel dims are zero-padded to a multiple of this (lane dim)
SUBPACK = 16   # bf16 sublane packing: time offsets are kept multiples of this


def _round_up(x, m):
    return (x + m - 1) // m * m


def _pick_batch_tile(B, Tp, target_rows=2048):
    """Batch rows per grid step: ~2048 matmul rows per step (feeds the 256-wide
    MXUs of v6e/v7x and amortizes the ~0.35us/step overhead), but always >=2
    grid steps when B >= 2 so v7x's two TensorCores both get work."""
    bt = max(1, min(B, target_rows // max(Tp, 1)))
    if B >= 2:
        bt = min(bt, B // 2)
    bt = max(1, bt)
    while B % bt:
        bt -= 1
    return bt


def _vmem_limit_bytes():
    """Raise the scoped-VMEM limit above the 16/32 MiB defaults while leaving
    headroom under physical capacity (64 MiB on v7x, 128 MiB on v5e/v6e)."""
    try:
        cap = pltpu.get_tpu_info().vmem_capacity_bytes
    except Exception:
        cap = 64 * 1024 * 1024
    return int(min(100 * 1024 * 1024, (cap * 3) // 4))


_ROLL_IS_NUMPY_LIKE = None


def _roll_is_numpy_like():
    """One-time probe: does pltpu.roll match np.roll (shift toward higher
    indices)?  The conv kernel only needs that direction; this keeps it
    correct under either rotation convention."""
    global _ROLL_IS_NUMPY_LIKE
    if _ROLL_IS_NUMPY_LIKE is None:
        def kern(x_ref, o_ref):
            o_ref[...] = pltpu.roll(x_ref[...], shift=1, axis=0)

        x = jnp.broadcast_to(jnp.arange(8, dtype=jnp.float32)[:, None],
                             (8, LANE))
        out = pl.pallas_call(
            kern, out_shape=jax.ShapeDtypeStruct((8, LANE), jnp.float32))(x)
        _ROLL_IS_NUMPY_LIKE = bool(out[1, 0] == 0.0)
    return _ROLL_IS_NUMPY_LIKE


# ----------------------------------------------------------------------------
# Fused TemporalBlock kernel:
#   h1  = relu(conv1(x) + b1)              (dilated causal)
#   net = relu(conv2(h1) + b2)             (dilated causal)
#   out = relu(net + residual)             residual = downsample(x)+bd or x
# All intermediates (causally padded x, h1, f32 accumulator) live in VMEM.
# ----------------------------------------------------------------------------
def _make_block_kernel(k, dilation, pad16, has_down, roll_np_like):
    shifts = [(k - 1 - j) * dilation for j in range(k)]

    def kernel(*refs):
        if has_down:
            (x_ref, w1_ref, b1_ref, w2_ref, b2_ref, wd_ref, bd_ref,
             o_ref, xpad_ref, hpad_ref, acc_ref) = refs
        else:
            (x_ref, w1_ref, b1_ref, w2_ref, b2_ref,
             o_ref, xpad_ref, hpad_ref, acc_ref) = refs

        bt, T, cin = x_ref.shape
        cout = o_ref.shape[-1]
        S = pad16 + T          # rows of the causally padded buffers
        M = bt * T             # batch folded into the matmul M dimension
        L = bt * S             # flattened padded rows (for the output roll)

        # Causal zero prefix + activation copy live only in bf16 VMEM scratch.
        # The prefix is tiny (<= pad16 rows) and re-zeroed every step so the
        # kernel stays correct when the batch grid axis is split across cores.
        if pad16 > 0:
            xpad_ref[:, :pad16, :] = jnp.zeros((bt, pad16, cin),
                                               xpad_ref.dtype)
            hpad_ref[:, :pad16, :] = jnp.zeros((bt, pad16, cout),
                                               hpad_ref.dtype)
        xpad_ref[:, pad16:, :] = x_ref[...]

        def conv_taps(pad_ref, w_ref, c_in):
            """acc_ref <- sum_j x[t - (k-1-j)*dilation] @ W_j (causal conv)."""
            first = True
            for j in range(k):
                s = shifts[j]
                if s % SUBPACK == 0:
                    # 16-aligned read start: direct slice, no relayout copy.
                    lhs = pad_ref[:, pad16 - s:pad16 - s + T, :].reshape(M,
                                                                         c_in)
                    contrib = jnp.dot(
                        lhs, w_ref[j], preferred_element_type=jnp.float32
                    ).reshape(bt, T, cout)
                else:
                    # Unaligned shift: matmul the whole padded buffer (aligned
                    # bf16 read) and rotate the f32 result along time on the
                    # XLU.  Wrapped rows land inside the discarded [0, pad16)
                    # causal prefix, so a flat roll over bt*S rows is exact
                    # for the rows we keep.
                    lhs = pad_ref[...].reshape(L, c_in)
                    p = jnp.dot(lhs, w_ref[j],
                                preferred_element_type=jnp.float32)
                    amt = s if roll_np_like else (L - s) % L
                    p = pltpu.roll(p, shift=amt, axis=0)
                    contrib = p.reshape(bt, S, cout)[:, pad16:, :]
                if first:
                    acc_ref[...] = contrib
                    first = False
                else:
                    acc_ref[...] += contrib

        # conv1 -> +bias -> relu -> bf16 scratch (h1 never touches HBM)
        conv_taps(xpad_ref, w1_ref, cin)
        h1 = jnp.maximum(acc_ref[...].reshape(M, cout) + b1_ref[...], 0.0)
        hpad_ref[:, pad16:, :] = h1.reshape(bt, T, cout).astype(hpad_ref.dtype)

        # conv2 -> +bias -> relu (this is PyTorch's relu2, applied BEFORE the
        # residual add)
        conv_taps(hpad_ref, w2_ref, cout)
        net = jnp.maximum(acc_ref[...].reshape(M, cout) + b2_ref[...], 0.0)

        # Residual path reads the already-resident bf16 scratch (no re-cast).
        if has_down:
            xa = xpad_ref[:, pad16:, :].reshape(M, cin)
            res = (jnp.dot(xa, wd_ref[...],
                           preferred_element_type=jnp.float32)
                   + bd_ref[...])
        else:
            res = xpad_ref[:, pad16:, :].reshape(M, cin).astype(jnp.float32)

        out = jnp.maximum(net + res, 0.0)
        o_ref[...] = out.reshape(bt, T, cout).astype(o_ref.dtype)

    return kernel


def temporal_block(x, bp, dilation, kernel_size):
    """x: (B, Tp, Cin_p) bf16 with Tp % 16 == 0 and Cin_p % 128 == 0."""
    B, Tp, cin_p = x.shape
    k = kernel_size
    cout_p = bp["w1"].shape[-1]
    has_down = "wd" in bp

    pad = (k - 1) * dilation
    pad16 = _round_up(pad, SUBPACK) if pad > 0 else 0
    S = pad16 + Tp
    bt = _pick_batch_tile(B, Tp)
    grid = (B // bt,)
    # TODO(synk): for very long sequences add a time-tile grid axis with a
    # (k-1)*dilation halo so a single block never outgrows v7x's 64 MiB VMEM.

    in_specs = [
        pl.BlockSpec((bt, Tp, cin_p), lambda i: (i, 0, 0)),
        pl.BlockSpec((k, cin_p, cout_p), lambda i: (0, 0, 0)),
        pl.BlockSpec((1, cout_p), lambda i: (0, 0)),
        pl.BlockSpec((k, cout_p, cout_p), lambda i: (0, 0, 0)),
        pl.BlockSpec((1, cout_p), lambda i: (0, 0)),
    ]
    args = [x, bp["w1"], bp["b1"], bp["w2"], bp["b2"]]
    if has_down:
        in_specs += [
            pl.BlockSpec((cin_p, cout_p), lambda i: (0, 0)),
            pl.BlockSpec((1, cout_p), lambda i: (0, 0)),
        ]
        args += [bp["wd"], bp["bd"]]

    kernel = _make_block_kernel(k, dilation, pad16, has_down,
                                _roll_is_numpy_like())

    return pl.pallas_call(
        kernel,
        out_shape=jax.ShapeDtypeStruct((B, Tp, cout_p), jnp.bfloat16),
        grid=grid,
        in_specs=in_specs,
        out_specs=pl.BlockSpec((bt, Tp, cout_p), lambda i: (i, 0, 0)),
        scratch_shapes=[
            pltpu.VMEM((bt, S, cin_p), jnp.bfloat16),   # causally padded x
            pltpu.VMEM((bt, S, cout_p), jnp.bfloat16),  # causally padded h1
            pltpu.VMEM((bt, Tp, cout_p), jnp.float32),  # f32 conv accumulator
        ],
        compiler_params=pltpu.CompilerParams(
            dimension_semantics=("parallel",),
            vmem_limit_bytes=_vmem_limit_bytes()),
    )(*args)


# ----------------------------------------------------------------------------
# TCN forward (glue in JAX, compute in the fused Pallas block kernel)
# ----------------------------------------------------------------------------
def tcn_forward(inputs, lens, params):
    k = params["kernel_size"]
    # embeds = Embedding(inputs) + PE(lens) -> (B, T, Cp); padded lanes are 0.
    # TODO(synk): 'lens' is consumed as per-position PE indices (as the test
    # drives it); scalar sequence lengths would need different handling.
    emb = params["emb"][inputs] + params["pe"][lens]
    B, T, _ = emb.shape
    Tp = _round_up(T, SUBPACK)   # pad time to bf16 sublane pack (causal => safe)
    x = emb.astype(jnp.bfloat16)
    if Tp != T:
        x = jnp.pad(x, ((0, 0), (0, Tp - T), (0, 0)))
    for i, bp in enumerate(params["blocks"]):
        x = temporal_block(x, bp, 2 ** i, k)
    return x[:, :T, :params["channel"]].astype(jnp.float32)


# ----------------------------------------------------------------------------
# Pure-JAX reference (same bf16 rounding points) for in-script validation
# ----------------------------------------------------------------------------
def _ref_causal_conv(x, w, d):
    B, T, _ = x.shape
    k = w.shape[0]
    pad = (k - 1) * d
    xp = jnp.pad(x, ((0, 0), (pad, 0), (0, 0)))
    y = 0.0
    for j in range(k):
        off = pad - (k - 1 - j) * d
        y = y + jnp.einsum('btc,cd->btd', xp[:, off:off + T, :],
                           w[j].astype(jnp.float32),
                           preferred_element_type=jnp.float32)
    return y


def tcn_reference(inputs, lens, params):
    x = (params["emb"][inputs] + params["pe"][lens]
         ).astype(jnp.bfloat16).astype(jnp.float32)
    for i, bp in enumerate(params["blocks"]):
        d = 2 ** i
        h1 = jax.nn.relu(_ref_causal_conv(x, bp["w1"], d) + bp["b1"][0])
        h1 = h1.astype(jnp.bfloat16).astype(jnp.float32)
        net = jax.nn.relu(_ref_causal_conv(h1, bp["w2"], d) + bp["b2"][0])
        if "wd" in bp:
            res = jnp.einsum('btc,cd->btd', x, bp["wd"].astype(jnp.float32),
                             preferred_element_type=jnp.float32) + bp["bd"][0]
        else:
            res = x
        y = jax.nn.relu(net + res)
        x = y.astype(jnp.bfloat16).astype(jnp.float32)
    return x[:, :, :params["channel"]]


# ----------------------------------------------------------------------------
# Deterministic parameter construction (channel dims zero-padded to 128 lanes)
# ----------------------------------------------------------------------------
def position_encoding_init(n_position, d_pos_vec):
    pos = np.arange(n_position)[:, None].astype(np.float64)
    j = np.arange(d_pos_vec)[None, :]
    angle = pos / np.power(10000.0, 2 * (j // 2) / d_pos_vec)
    table = np.where(pos != 0, angle, 0.0)
    table[1:, 0::2] = np.sin(table[1:, 0::2])
    table[1:, 1::2] = np.cos(table[1:, 1::2])
    return jnp.asarray(table, jnp.float32)


def init_params(key, embedding_dim, max_length, channel, level, kernel_size,
                character_size=252):
    # TODO(synk): PyTorch wraps conv1/conv2 in weight_norm; that is an identity
    # reparameterization at fresh init, so raw weights are used here.
    cin0_p = _round_up(embedding_dim, LANE)
    ch_p = _round_up(channel, LANE)

    keys = jax.random.split(key, 2 + 6 * level)
    ki = iter(keys)

    emb = jax.random.normal(next(ki), (character_size, embedding_dim),
                            jnp.float32) * 0.1
    emb = emb.at[0].set(0.0)  # padding_idx=0
    emb = jnp.pad(emb, ((0, 0), (0, cin0_p - embedding_dim)))

    pe = position_encoding_init(max_length, embedding_dim)
    pe = jnp.pad(pe, ((0, 0), (0, cin0_p - embedding_dim)))

    gain = math.sqrt(2.0)

    def xavier(k_, shape):  # shape = (k, cin, cout)
        fan_in = shape[0] * shape[1]
        fan_out = shape[0] * shape[2]
        bound = gain * math.sqrt(6.0 / (fan_in + fan_out))
        return jax.random.uniform(k_, shape, jnp.float32, -bound, bound)

    blocks = []
    for i in range(level):
        cin = embedding_dim if i == 0 else channel
        cin_p = cin0_p if i == 0 else ch_p
        cout, cout_p = channel, ch_p

        w1 = xavier(next(ki), (kernel_size, cin, cout))
        b1 = jax.random.normal(next(ki), (cout,), jnp.float32) * 0.01
        w2 = xavier(next(ki), (kernel_size, cout, cout))
        b2 = jax.random.normal(next(ki), (cout,), jnp.float32) * 0.01

        bp = {
            # weights stored (k, Cin_p, Cout_p) bf16 (zero-padded, lane-dense)
            "w1": jnp.pad(w1, ((0, 0), (0, cin_p - cin),
                               (0, cout_p - cout))).astype(jnp.bfloat16),
            "b1": jnp.pad(b1, (0, cout_p - cout)).reshape(1, cout_p),
            "w2": jnp.pad(w2, ((0, 0), (0, cout_p - cout),
                               (0, cout_p - cout))).astype(jnp.bfloat16),
            "b2": jnp.pad(b2, (0, cout_p - cout)).reshape(1, cout_p),
        }
        if cin != cout:
            wd = xavier(next(ki), (1, cin, cout))[0]          # (cin, cout)
            bd = jax.random.normal(next(ki), (cout,), jnp.float32) * 0.01
            bp["wd"] = jnp.pad(wd, ((0, cin_p - cin),
                                    (0, cout_p - cout))).astype(jnp.bfloat16)
            bp["bd"] = jnp.pad(bd, (0, cout_p - cout)).reshape(1, cout_p)
        else:
            next(ki); next(ki)
        blocks.append(bp)

    return {"emb": emb, "pe": pe, "blocks": blocks,
            "channel": channel, "kernel_size": kernel_size}


# ----------------------------------------------------------------------------
if __name__ == "__main__":
    # small shapes consistent with the module
    B = 2
    embedding_dim = 16
    max_length = 8          # sequence length T
    channel = 32
    level = 3
    kernel_size = 3

    key = jax.random.PRNGKey(0)
    pkey, ikey = jax.random.split(key)
    params = init_params(pkey, embedding_dim, max_length, channel, level,
                         kernel_size)

    # token ids in [1, 252), positional indices 0..T-1 for the PE lookup
    inputs = jax.random.randint(ikey, (B, max_length), 1, 252, dtype=jnp.int32)
    lens = jnp.tile(jnp.arange(max_length, dtype=jnp.int32)[None, :], (B, 1))

    out = jax.block_until_ready(tcn_forward(inputs, lens, params))
    assert out.shape == (B, max_length, channel), out.shape
    assert bool(jnp.all(jnp.isfinite(out)))

    ref = jax.block_until_ready(tcn_reference(inputs, lens, params))
    np.testing.assert_allclose(np.asarray(out), np.asarray(ref),
                               rtol=2e-2, atol=2e-2)
    print("KERNEL_OK")
</pallas_src>

<mosaic_0001>
module attributes {stable_mosaic.version = 11 : i64} {
  func.func @kern(%arg0: memref<8x128xf32, #tpu.memory_space<vmem>>, %arg1: memref<8x128xf32, #tpu.memory_space<vmem>>) attributes {dimension_semantics = [], scalar_prefetch = 0 : i64, scratch_operands = 0 : i64, tpu.core_type = #tpu.core_type<tc>} {
    %c0 = arith.constant 0 : index
    %c0_0 = arith.constant 0 : index
    %0 = vector.load %arg0[%c0, %c0_0] : memref<8x128xf32, #tpu.memory_space<vmem>>, vector<8x128xf32>
    %c1_i32 = arith.constant 1 : i32
    %1 = tpu.dynamic_rotate %0 by %c1_i32 dim 0 : vector<8x128xf32>, i32 -> vector<8x128xf32>
    %c0_1 = arith.constant 0 : index
    %c0_2 = arith.constant 0 : index
    %2 = vector.load %arg1[%c0_1, %c0_2] : memref<8x128xf32, #tpu.memory_space<vmem>>, vector<8x128xf32>
    tpu.vector_store %arg1[%c0_1, %c0_2], %1 {strides = array<i32>} : memref<8x128xf32, #tpu.memory_space<vmem>>, vector<8x128xf32>,
    return
  }
}

</mosaic_0001>

<bundles_post_ra>
// kernel: tpu_custom_call.1
= control target key start
LH: loop header
LB: loop body
LE: loop exit
PB: predicated region body
PF: predicated region fallthrough
CT: control target
= control target key end

     0   :  { %6 = vsyncpa [#allocation3], 0  ;;  %s115_s0 = inlined_call_operand.hbm [shape: f32[8,128], index: 0, kind: input, shape index: {}]   ;;  %s116_s1 = inlined_call_operand.hbm [shape: f32[8,128], index: 1, kind: output, shape index: {}]  }
   0x1   :  { %7 = vsyncpa [#allocation4], 0  ;;  %s13_s8 = sshll.u32 %s115_s0, 4  ;;  %s97_s9 = smov [#allocation2]   ;;  %s14_s8 = int_to_ptr.hbm [resolvable:$true] %s13_s8 }
   0x2   :  { %s15_s10 = sshll.u32 %s97_s9, 4  ;;  %s16_s10 = int_to_ptr.vmem [resolvable:$true] %s15_s10 }
   0x3   :  { %18 = dma.hbm_to_vmem [thread:$0]  %s14_s8, 128, %s16_s10, [#allocation3]  }
   0x4   :  { %93 = dma.done.wait [#allocation3], 128  }
   0x5   :  { %94 = vsyncadd [#allocation3], 4294967168  ;;  %s98_s11 = smov [#allocation5]   ;;  %s33_s15 = sshll.u32 %s116_s1, 4  ;;  %v23_v0 = vld [vmem:[#allocation2] sm:$0xff]  ;;  %s34_s15 = int_to_ptr.hbm [resolvable:$true] %s33_s15 }
   0x6   :  { %s31_s12 = sshll.u32 %s98_s11, 4  ;;  %v24_v1 = vrot.slane %v23_v0, 7  ;;  %s32_s12 = int_to_ptr.vmem [resolvable:$true] %s31_s12 }
   0x8   :  { %25 = vst [vmem:[#allocation5] sm:$0xff] %v24_v1 }
   0x9   :  { %36 = dma.vmem_to_hbm [thread:$0]  %s32_s12, 128, %s34_s15, [#allocation4]  }
   0xa   :  { %95 = dma.done.wait [#allocation4], 128  }
   0xb   :  { %96 = vsyncadd [#allocation4], 4294967168 }
   0xc   :  { %41 = vsyncpa [#allocation3], 1 }
   0xd   :  { %42 = vsyncpa [#allocation4], 1 }

</bundles_post_ra>
